<compile_context>
chip_gen: v6e
topology: v6e:2x2x1
jax: 0.10.0
libtpu: 0.0.40
codegen_flags: <defaults>
</compile_context>

<pallas_src>
import functools

import jax
import jax.numpy as jnp
from jax import lax
from jax.experimental import pallas as pl
from jax.experimental.pallas import tpu as pltpu


LANE = 128        # vreg lane width
SUBLANE = 8       # vreg sublane count
MAX_TILE_B = 2048  # safe under default scoped VMEM on v5e/v6e/v7x with narrow outputs


# ----------------------------------------------------------------------------
# Small helpers
# ----------------------------------------------------------------------------
def _cdiv(a, b):
    return -(-a // b)


def _round_up(x, m):
    return ((x + m - 1) // m) * m


def _pad2(a, rows, cols):
    pr, pc = rows - a.shape[0], cols - a.shape[1]
    if pr == 0 and pc == 0:
        return a
    return jnp.pad(a, ((0, pr), (0, pc)))


def _choose_tile_b(batch):
    """Sublane-aligned batch tile; >=2 grid steps when the batch allows it
    (megacore on v7x), last tile never mostly padding."""
    b8 = _round_up(batch, SUBLANE)
    n_tiles = _cdiv(b8, MAX_TILE_B)
    if b8 >= 2 * SUBLANE:
        n_tiles = max(n_tiles, 2)
    return _round_up(_cdiv(b8, n_tiles), SUBLANE)


def _pad_batch(obs, tile_b):
    b = obs.shape[0]
    b_pad = _round_up(b, tile_b)
    if b_pad != b:
        obs = jnp.pad(obs, ((0, b_pad - b), (0, 0)))
    return obs, b_pad


def _resident_spec(shape):
    # Full-extent block with a constant block index -> fetched once, stays in
    # VMEM for the whole grid (weights / biases).
    return pl.BlockSpec(shape, lambda i: (0, 0))


def _batch_spec(tile_b, dim):
    # Streamed (TILE_B, dim) block along the batch grid axis.
    return pl.BlockSpec((tile_b, dim), lambda i: (i, 0))


# ----------------------------------------------------------------------------
# Parameter preparation (hoisted out of the per-step forward; call ONCE)
# ----------------------------------------------------------------------------
def prepare_params(params, compute_dtype=jnp.float32):
    """Pad/cast a single-network (w1,b1,w2,b2,w3,b3,wh,bh) parameter set.

    Hidden dims are zero-padded to 128 lanes (exact through ReLU); the head is
    padded only to a sublane multiple (8), NOT 128 lanes, so output writeback
    stays narrow.  Weights -> compute_dtype (MXU); biases stay f32 (VPU/EUP).
    """
    w1, b1, w2, b2, w3, b3, wh, bh = params
    h1 = _round_up(w1.shape[1], LANE)
    h2 = _round_up(w3.shape[1], LANE)
    od = _round_up(wh.shape[1], SUBLANE)
    prepared = (
        _pad2(w1, w1.shape[0], h1).astype(compute_dtype),
        _pad2(b1, 1, h1).astype(jnp.float32),
        _pad2(w2, h1, h1).astype(compute_dtype),
        _pad2(b2, 1, h1).astype(jnp.float32),
        _pad2(w3, h1, h2).astype(compute_dtype),
        _pad2(b3, 1, h2).astype(jnp.float32),
        _pad2(wh, h2, od).astype(compute_dtype),
        _pad2(bh, 1, od).astype(jnp.float32),
    )
    return prepared


def prepare_fused_params(actor_params, critic_params, compute_dtype=jnp.float32):
    """Pad/cast actor+critic params and build the combined narrow head.

    The combined head output width is round_up(n_actions + 1, 8); actor logits
    occupy cols [0, n_actions), the value occupies col n_actions.
    Returns (prepared_tuple, n_actions).
    """
    aw1, ab1, aw2, ab2, aw3, ab3, awh, abh = actor_params
    cw1, cb1, cw2, cb2, cw3, cb3, cwh, cbh = critic_params
    assert aw1.shape == cw1.shape and aw3.shape[1] == cw3.shape[1], \
        "actor and critic trunks must share the architecture"

    n_actions = awh.shape[1]
    h1 = _round_up(aw1.shape[1], LANE)
    h2 = _round_up(aw3.shape[1], LANE)
    out_w = _round_up(n_actions + 1, SUBLANE)

    wha = jnp.zeros((h2, out_w), jnp.float32)
    wha = wha.at[: awh.shape[0], :n_actions].set(awh)
    whc = jnp.zeros((h2, out_w), jnp.float32)
    whc = whc.at[: cwh.shape[0], n_actions : n_actions + 1].set(cwh)
    bh = jnp.zeros((1, out_w), jnp.float32)
    bh = bh.at[:, :n_actions].set(abh)
    bh = bh.at[:, n_actions : n_actions + 1].set(cbh)

    prepared = (
        _pad2(aw1, aw1.shape[0], h1).astype(compute_dtype),
        _pad2(ab1, 1, h1).astype(jnp.float32),
        _pad2(aw2, h1, h1).astype(compute_dtype),
        _pad2(ab2, 1, h1).astype(jnp.float32),
        _pad2(aw3, h1, h2).astype(compute_dtype),
        _pad2(ab3, 1, h2).astype(jnp.float32),
        _pad2(cw1, cw1.shape[0], h1).astype(compute_dtype),
        _pad2(cb1, 1, h1).astype(jnp.float32),
        _pad2(cw2, h1, h1).astype(compute_dtype),
        _pad2(cb2, 1, h1).astype(jnp.float32),
        _pad2(cw3, h1, h2).astype(compute_dtype),
        _pad2(cb3, 1, h2).astype(jnp.float32),
        wha.astype(compute_dtype),
        whc.astype(compute_dtype),
        bh,
    )
    return prepared, n_actions


# ----------------------------------------------------------------------------
# Kernel bodies
# ----------------------------------------------------------------------------
def _linear_relu(x, w_ref, b_ref, compute_dtype):
    y = jnp.dot(x.astype(compute_dtype), w_ref[...],
                preferred_element_type=jnp.float32) + b_ref[...]
    return jnp.maximum(y, 0.0)                       # f32 elementwise (v5e-safe)


def _trunk(x, w1, b1, w2, b2, w3, b3, compute_dtype):
    h = _linear_relu(x, w1, b1, compute_dtype)
    h = _linear_relu(h, w2, b2, compute_dtype)
    h = _linear_relu(h, w3, b3, compute_dtype)
    return h


def _sigmoid(y):
    # exp -> EUP, approx reciprocal -> EUP: divide stays off the VALU.
    return pl.reciprocal(1.0 + jnp.exp(-y), approx=True)


def _single_kernel(x_ref, w1, b1, w2, b2, w3, b3, wh, bh, out_ref,
                   *, is_critic, compute_dtype):
    x = jnp.clip(x_ref[...], -10.0, 10.0)            # obs clamp in f32
    h = _trunk(x, w1, b1, w2, b2, w3, b3, compute_dtype)
    y = jnp.dot(h.astype(compute_dtype), wh[...],
                preferred_element_type=jnp.float32) + bh[...]
    if not is_critic:
        # MultiBinary actor head: clamp(-5, 5) then sigmoid.
        y = _sigmoid(jnp.clip(y, -5.0, 5.0))
    out_ref[...] = y.astype(out_ref.dtype)
    # TODO(synk): MultiDiscrete actor variant (per-head log_softmax + concat)
    # not implemented; only MultiBinary actor and critic paths are covered.


def _fused_kernel(x_ref,
                  aw1, ab1, aw2, ab2, aw3, ab3,
                  cw1, cb1, cw2, cb2, cw3, cb3,
                  wha, whc, bh,
                  out_ref, *, n_actions, compute_dtype):
    x = jnp.clip(x_ref[...], -10.0, 10.0)
    ha = _trunk(x, aw1, ab1, aw2, ab2, aw3, ab3, compute_dtype)
    hc = _trunk(x, cw1, cb1, cw2, cb2, cw3, cb3, compute_dtype)
    # Combined narrow head (width 8): cols [0, n_actions) = actor logits,
    # col n_actions = value, remainder zero.
    y = (jnp.dot(ha.astype(compute_dtype), wha[...],
                 preferred_element_type=jnp.float32)
         + jnp.dot(hc.astype(compute_dtype), whc[...],
                   preferred_element_type=jnp.float32)
         + bh[...])
    lane = lax.broadcasted_iota(jnp.int32, y.shape, 1)
    ya = _sigmoid(jnp.clip(y, -5.0, 5.0))            # actor: clamp + sigmoid
    out_ref[...] = jnp.where(lane < n_actions, ya, y).astype(out_ref.dtype)


# ----------------------------------------------------------------------------
# Jitted wrappers (expect pre-padded params from prepare_* above)
# ----------------------------------------------------------------------------
@functools.partial(jax.jit, static_argnames=("out_dim", "is_critic"))
def mappo_forward(obs, prepared, *, out_dim, is_critic):
    """Single SimpleMAPPONetwork forward pass (MultiBinary actor or critic)."""
    batch, obs_dim = obs.shape
    compute_dtype = prepared[0].dtype
    out_w = prepared[-1].shape[1]
    tile_b = _choose_tile_b(batch)
    obs_p, b_pad = _pad_batch(obs.astype(jnp.float32), tile_b)

    kernel = functools.partial(_single_kernel, is_critic=is_critic,
                               compute_dtype=compute_dtype)
    out = pl.pallas_call(
        kernel,
        out_shape=jax.ShapeDtypeStruct((b_pad, out_w), jnp.float32),
        grid_spec=pl.GridSpec(
            grid=(b_pad // tile_b,),
            in_specs=[_batch_spec(tile_b, obs_dim)]
                     + [_resident_spec(p.shape) for p in prepared],
            out_specs=_batch_spec(tile_b, out_w),
        ),
        compiler_params=pltpu.CompilerParams(
            dimension_semantics=("parallel",)),
    )(obs_p, *prepared)
    return out[:batch, :out_dim]


@functools.partial(jax.jit, static_argnames=("n_actions",))
def mappo_forward_fused(obs, prepared, *, n_actions):
    """Fused actor + critic forward in ONE pallas_call.

    Returns (actor_probs (B, n_actions), values (B, 1)).
    """
    batch, obs_dim = obs.shape
    compute_dtype = prepared[0].dtype
    out_w = prepared[-1].shape[1]
    tile_b = _choose_tile_b(batch)
    obs_p, b_pad = _pad_batch(obs.astype(jnp.float32), tile_b)

    kernel = functools.partial(_fused_kernel, n_actions=n_actions,
                               compute_dtype=compute_dtype)
    out = pl.pallas_call(
        kernel,
        out_shape=jax.ShapeDtypeStruct((b_pad, out_w), jnp.float32),
        grid_spec=pl.GridSpec(
            grid=(b_pad // tile_b,),
            in_specs=[_batch_spec(tile_b, obs_dim)]
                     + [_resident_spec(p.shape) for p in prepared],
            out_specs=_batch_spec(tile_b, out_w),
        ),
        compiler_params=pltpu.CompilerParams(
            dimension_semantics=("parallel",)),
    )(obs_p, *prepared)
    return out[:batch, :n_actions], out[:batch, n_actions:n_actions + 1]


# ----------------------------------------------------------------------------
# Deterministic parameter init (mirrors xavier_uniform_; note the PyTorch
# module re-initializes ALL Linear layers with gain=0.5 in _init_weights,
# which runs last and overrides the actor head's gain=0.1).
# ----------------------------------------------------------------------------
def _xavier_uniform(key, fan_in, fan_out, gain):
    bound = gain * jnp.sqrt(6.0 / (fan_in + fan_out))
    # Stored as (in_features, out_features) = transpose of nn.Linear.weight.
    return jax.random.uniform(key, (fan_in, fan_out), jnp.float32,
                              minval=-bound, maxval=bound)


def init_params(key, obs_dim, hidden_dim, head_dim):
    k1, k2, k3, k4 = jax.random.split(key, 4)
    half = hidden_dim // 2
    w1 = _xavier_uniform(k1, obs_dim, hidden_dim, gain=0.5)
    b1 = jnp.zeros((1, hidden_dim), jnp.float32)
    w2 = _xavier_uniform(k2, hidden_dim, hidden_dim, gain=0.5)
    b2 = jnp.zeros((1, hidden_dim), jnp.float32)
    w3 = _xavier_uniform(k3, hidden_dim, half, gain=0.5)
    b3 = jnp.zeros((1, half), jnp.float32)
    wh = _xavier_uniform(k4, half, head_dim, gain=0.5)
    bh = jnp.zeros((1, head_dim), jnp.float32)
    return (w1, b1, w2, b2, w3, b3, wh, bh)


# ----------------------------------------------------------------------------
# Pure-JAX reference for verification
# ----------------------------------------------------------------------------
def reference_forward(obs, params, *, is_critic):
    w1, b1, w2, b2, w3, b3, wh, bh = params
    x = jnp.clip(obs, -10.0, 10.0)
    h = jax.nn.relu(x @ w1 + b1)
    h = jax.nn.relu(h @ w2 + b2)
    h = jax.nn.relu(h @ w3 + b3)
    y = h @ wh + bh
    if not is_critic:
        y = jax.nn.sigmoid(jnp.clip(y, -5.0, 5.0))
    return y


if __name__ == "__main__":
    import numpy as np

    key = jax.random.PRNGKey(0)
    k_obs, k_actor, k_critic, k_obs2 = jax.random.split(key, 4)

    batch = 8
    obs_dim = 16
    hidden_dim = 32      # hidden_dim // 2 = 16
    n_actions = 6        # MultiBinary(6) actor head

    obs = jax.random.normal(k_obs, (batch, obs_dim), jnp.float32) * 5.0

    actor_params = init_params(k_actor, obs_dim, hidden_dim, n_actions)
    critic_params = init_params(k_critic, obs_dim, hidden_dim, 1)

    actor_ref = reference_forward(obs, actor_params, is_critic=False)
    critic_ref = reference_forward(obs, critic_params, is_critic=True)

    # Prepare (pad + cast) params ONCE — hoisted out of the forward loop.
    fused_f32, na = prepare_fused_params(actor_params, critic_params)
    fused_bf16, _ = prepare_fused_params(actor_params, critic_params,
                                         compute_dtype=jnp.bfloat16)
    actor_prep = prepare_params(actor_params)
    critic_prep = prepare_params(critic_params)

    # --- Fused actor + critic, f32 weights ---------------------------------
    # (actor tolerance is loosened slightly because the sigmoid uses the EUP
    #  approx reciprocal; the value lane is exact.)
    a_out, v_out = mappo_forward_fused(obs, fused_f32, n_actions=na)
    a_out, v_out = jax.block_until_ready((a_out, v_out))
    np.testing.assert_allclose(np.asarray(a_out), np.asarray(actor_ref),
                               rtol=2e-3, atol=2e-3)
    np.testing.assert_allclose(np.asarray(v_out), np.asarray(critic_ref),
                               rtol=1e-5, atol=1e-5)
    assert a_out.shape == (batch, n_actions)
    assert v_out.shape == (batch, 1)

    # --- Fused actor + critic, bf16 weights/activations on the MXU ---------
    a16, v16 = mappo_forward_fused(obs, fused_bf16, n_actions=na)
    a16, v16 = jax.block_until_ready((a16, v16))
    np.testing.assert_allclose(np.asarray(a16), np.asarray(actor_ref),
                               rtol=5e-2, atol=5e-2)
    np.testing.assert_allclose(np.asarray(v16), np.asarray(critic_ref),
                               rtol=5e-2, atol=5e-2)

    # --- Single-network paths (actor only / critic only), f32 --------------
    a_single = mappo_forward(obs, actor_prep, out_dim=n_actions,
                             is_critic=False)
    v_single = mappo_forward(obs, critic_prep, out_dim=1, is_critic=True)
    a_single, v_single = jax.block_until_ready((a_single, v_single))
    np.testing.assert_allclose(np.asarray(a_single), np.asarray(actor_ref),
                               rtol=2e-3, atol=2e-3)
    np.testing.assert_allclose(np.asarray(v_single), np.asarray(critic_ref),
                               rtol=1e-5, atol=1e-5)

    # --- Larger, non-multiple batch: exercises multi-tile grid (>=2 steps
    #     for v7x megacore) and batch padding of the last tile. --------------
    big_batch = 300
    obs_big = jax.random.normal(k_obs2, (big_batch, obs_dim), jnp.float32) * 5.0
    a_big, v_big = mappo_forward_fused(obs_big, fused_f32, n_actions=na)
    a_big, v_big = jax.block_until_ready((a_big, v_big))
    np.testing.assert_allclose(
        np.asarray(a_big),
        np.asarray(reference_forward(obs_big, actor_params, is_critic=False)),
        rtol=2e-3, atol=2e-3)
    np.testing.assert_allclose(
        np.asarray(v_big),
        np.asarray(reference_forward(obs_big, critic_params, is_critic=True)),
        rtol=1e-5, atol=1e-5)
    assert a_big.shape == (big_batch, n_actions)
    assert v_big.shape == (big_batch, 1)

    print("KERNEL_OK")
</pallas_src>

<mosaic_0001>
module attributes {stable_mosaic.version = 11 : i64} {
  func.func @_fused_kernel(%arg0: i32, %arg1: memref<8x16xf32, #tpu.memory_space<vmem>>, %arg2: memref<16x128xf32, #tpu.memory_space<vmem>>, %arg3: memref<1x128xf32, #tpu.memory_space<vmem>>, %arg4: memref<128x128xf32, #tpu.memory_space<vmem>>, %arg5: memref<1x128xf32, #tpu.memory_space<vmem>>, %arg6: memref<128x128xf32, #tpu.memory_space<vmem>>, %arg7: memref<1x128xf32, #tpu.memory_space<vmem>>, %arg8: memref<16x128xf32, #tpu.memory_space<vmem>>, %arg9: memref<1x128xf32, #tpu.memory_space<vmem>>, %arg10: memref<128x128xf32, #tpu.memory_space<vmem>>, %arg11: memref<1x128xf32, #tpu.memory_space<vmem>>, %arg12: memref<128x128xf32, #tpu.memory_space<vmem>>, %arg13: memref<1x128xf32, #tpu.memory_space<vmem>>, %arg14: memref<128x8xf32, #tpu.memory_space<vmem>>, %arg15: memref<128x8xf32, #tpu.memory_space<vmem>>, %arg16: memref<1x8xf32, #tpu.memory_space<vmem>>, %arg17: memref<8x8xf32, #tpu.memory_space<vmem>>) attributes {dimension_semantics = [#tpu.dimension_semantics<parallel>], iteration_bounds = array<i64: 1>, scalar_prefetch = 0 : i64, scratch_operands = 0 : i64, tpu.core_type = #tpu.core_type<tc>, window_params = [{transform_indices = @transform_0, window_bounds = array<i64: 8, 16>}, {pipeline_mode = #tpu.pipeline_mode<synchronous>, transform_indices = @transform_1, window_bounds = array<i64: 16, 128>}, {pipeline_mode = #tpu.pipeline_mode<synchronous>, transform_indices = @transform_2, window_bounds = array<i64: 1, 128>}, {pipeline_mode = #tpu.pipeline_mode<synchronous>, transform_indices = @transform_3, window_bounds = array<i64: 128, 128>}, {pipeline_mode = #tpu.pipeline_mode<synchronous>, transform_indices = @transform_4, window_bounds = array<i64: 1, 128>}, {pipeline_mode = #tpu.pipeline_mode<synchronous>, transform_indices = @transform_5, window_bounds = array<i64: 128, 128>}, {pipeline_mode = #tpu.pipeline_mode<synchronous>, transform_indices = @transform_6, window_bounds = array<i64: 1, 128>}, {pipeline_mode = #tpu.pipeline_mode<synchronous>, transform_indices = @transform_7, window_bounds = array<i64: 16, 128>}, {pipeline_mode = #tpu.pipeline_mode<synchronous>, transform_indices = @transform_8, window_bounds = array<i64: 1, 128>}, {pipeline_mode = #tpu.pipeline_mode<synchronous>, transform_indices = @transform_9, window_bounds = array<i64: 128, 128>}, {pipeline_mode = #tpu.pipeline_mode<synchronous>, transform_indices = @transform_10, window_bounds = array<i64: 1, 128>}, {pipeline_mode = #tpu.pipeline_mode<synchronous>, transform_indices = @transform_11, window_bounds = array<i64: 128, 128>}, {pipeline_mode = #tpu.pipeline_mode<synchronous>, transform_indices = @transform_12, window_bounds = array<i64: 1, 128>}, {pipeline_mode = #tpu.pipeline_mode<synchronous>, transform_indices = @transform_13, window_bounds = array<i64: 128, 8>}, {pipeline_mode = #tpu.pipeline_mode<synchronous>, transform_indices = @transform_14, window_bounds = array<i64: 128, 8>}, {pipeline_mode = #tpu.pipeline_mode<synchronous>, transform_indices = @transform_15, window_bounds = array<i64: 1, 8>}, {transform_indices = @transform_16, window_bounds = array<i64: 8, 8>}]} {
    %c0 = arith.constant 0 : index
    %c0_0 = arith.constant 0 : index
    %0 = vector.load %arg1[%c0, %c0_0] : memref<8x16xf32, #tpu.memory_space<vmem>>, vector<8x16xf32>
    %cst = arith.constant -1.000000e+01 : f32
    %cst_1 = arith.constant 1.000000e+01 : f32
    %1 = vector.broadcast %cst : f32 to vector<8x16xf32>
    %2 = arith.maximumf %1, %0 : vector<8x16xf32>
    %3 = vector.broadcast %cst_1 : f32 to vector<8x16xf32>
    %4 = arith.minimumf %3, %2 : vector<8x16xf32>
    %c0_2 = arith.constant 0 : index
    %c0_3 = arith.constant 0 : index
    %5 = vector.load %arg2[%c0_2, %c0_3] : memref<16x128xf32, #tpu.memory_space<vmem>>, vector<16x128xf32>
    %cst_4 = arith.constant dense<0.000000e+00> : vector<8x128xf32>
    %6 = tpu.matmul %4, %5, %cst_4 {dimension_numbers = #tpu.dot_dimension_numbers<[1], [0], [0], [1], [0, 0, 1, 1], [], []>} : vector<8x16xf32>, vector<16x128xf32>, vector<8x128xf32> -> vector<8x128xf32>
    %c0_5 = arith.constant 0 : index
    %c0_6 = arith.constant 0 : index
    %7 = vector.load %arg3[%c0_5, %c0_6] : memref<1x128xf32, #tpu.memory_space<vmem>>, vector<1x128xf32>
    %8 = vector.broadcast %7 : vector<1x128xf32> to vector<8x128xf32>
    %9 = arith.addf %6, %8 : vector<8x128xf32>
    %cst_7 = arith.constant 0.000000e+00 : f32
    %10 = vector.broadcast %cst_7 : f32 to vector<8x128xf32>
    %11 = arith.maximumf %9, %10 : vector<8x128xf32>
    %c0_8 = arith.constant 0 : index
    %c0_9 = arith.constant 0 : index
    %12 = vector.load %arg4[%c0_8, %c0_9] : memref<128x128xf32, #tpu.memory_space<vmem>>, vector<128x128xf32>
    %cst_10 = arith.constant dense<0.000000e+00> : vector<8x128xf32>
    %13 = tpu.matmul %11, %12, %cst_10 {dimension_numbers = #tpu.dot_dimension_numbers<[1], [0], [0], [1], [0, 0, 1, 1], [], []>} : vector<8x128xf32>, vector<128x128xf32>, vector<8x128xf32> -> vector<8x128xf32>
    %c0_11 = arith.constant 0 : index
    %c0_12 = arith.constant 0 : index
    %14 = vector.load %arg5[%c0_11, %c0_12] : memref<1x128xf32, #tpu.memory_space<vmem>>, vector<1x128xf32>
    %15 = vector.broadcast %14 : vector<1x128xf32> to vector<8x128xf32>
    %16 = arith.addf %13, %15 : vector<8x128xf32>
    %cst_13 = arith.constant 0.000000e+00 : f32
    %17 = vector.broadcast %cst_13 : f32 to vector<8x128xf32>
    %18 = arith.maximumf %16, %17 : vector<8x128xf32>
    %c0_14 = arith.constant 0 : index
    %c0_15 = arith.constant 0 : index
    %19 = vector.load %arg6[%c0_14, %c0_15] : memref<128x128xf32, #tpu.memory_space<vmem>>, vector<128x128xf32>
    %cst_16 = arith.constant dense<0.000000e+00> : vector<8x128xf32>
    %20 = tpu.matmul %18, %19, %cst_16 {dimension_numbers = #tpu.dot_dimension_numbers<[1], [0], [0], [1], [0, 0, 1, 1], [], []>} : vector<8x128xf32>, vector<128x128xf32>, vector<8x128xf32> -> vector<8x128xf32>
    %c0_17 = arith.constant 0 : index
    %c0_18 = arith.constant 0 : index
    %21 = vector.load %arg7[%c0_17, %c0_18] : memref<1x128xf32, #tpu.memory_space<vmem>>, vector<1x128xf32>
    %22 = vector.broadcast %21 : vector<1x128xf32> to vector<8x128xf32>
    %23 = arith.addf %20, %22 : vector<8x128xf32>
    %cst_19 = arith.constant 0.000000e+00 : f32
    %24 = vector.broadcast %cst_19 : f32 to vector<8x128xf32>
    %25 = arith.maximumf %23, %24 : vector<8x128xf32>
    %c0_20 = arith.constant 0 : index
    %c0_21 = arith.constant 0 : index
    %26 = vector.load %arg8[%c0_20, %c0_21] : memref<16x128xf32, #tpu.memory_space<vmem>>, vector<16x128xf32>
    %cst_22 = arith.constant dense<0.000000e+00> : vector<8x128xf32>
    %27 = tpu.matmul %4, %26, %cst_22 {dimension_numbers = #tpu.dot_dimension_numbers<[1], [0], [0], [1], [0, 0, 1, 1], [], []>} : vector<8x16xf32>, vector<16x128xf32>, vector<8x128xf32> -> vector<8x128xf32>
    %c0_23 = arith.constant 0 : index
    %c0_24 = arith.constant 0 : index
    %28 = vector.load %arg9[%c0_23, %c0_24] : memref<1x128xf32, #tpu.memory_space<vmem>>, vector<1x128xf32>
    %29 = vector.broadcast %28 : vector<1x128xf32> to vector<8x128xf32>
    %30 = arith.addf %27, %29 : vector<8x128xf32>
    %cst_25 = arith.constant 0.000000e+00 : f32
    %31 = vector.broadcast %cst_25 : f32 to vector<8x128xf32>
    %32 = arith.maximumf %30, %31 : vector<8x128xf32>
    %c0_26 = arith.constant 0 : index
    %c0_27 = arith.constant 0 : index
    %33 = vector.load %arg10[%c0_26, %c0_27] : memref<128x128xf32, #tpu.memory_space<vmem>>, vector<128x128xf32>
    %cst_28 = arith.constant dense<0.000000e+00> : vector<8x128xf32>
    %34 = tpu.matmul %32, %33, %cst_28 {dimension_numbers = #tpu.dot_dimension_numbers<[1], [0], [0], [1], [0, 0, 1, 1], [], []>} : vector<8x128xf32>, vector<128x128xf32>, vector<8x128xf32> -> vector<8x128xf32>
    %c0_29 = arith.constant 0 : index
    %c0_30 = arith.constant 0 : index
    %35 = vector.load %arg11[%c0_29, %c0_30] : memref<1x128xf32, #tpu.memory_space<vmem>>, vector<1x128xf32>
    %36 = vector.broadcast %35 : vector<1x128xf32> to vector<8x128xf32>
    %37 = arith.addf %34, %36 : vector<8x128xf32>
    %cst_31 = arith.constant 0.000000e+00 : f32
    %38 = vector.broadcast %cst_31 : f32 to vector<8x128xf32>
    %39 = arith.maximumf %37, %38 : vector<8x128xf32>
    %c0_32 = arith.constant 0 : index
    %c0_33 = arith.constant 0 : index
    %40 = vector.load %arg12[%c0_32, %c0_33] : memref<128x128xf32, #tpu.memory_space<vmem>>, vector<128x128xf32>
    %cst_34 = arith.constant dense<0.000000e+00> : vector<8x128xf32>
    %41 = tpu.matmul %39, %40, %cst_34 {dimension_numbers = #tpu.dot_dimension_numbers<[1], [0], [0], [1], [0, 0, 1, 1], [], []>} : vector<8x128xf32>, vector<128x128xf32>, vector<8x128xf32> -> vector<8x128xf32>
    %c0_35 = arith.constant 0 : index
    %c0_36 = arith.constant 0 : index
    %42 = vector.load %arg13[%c0_35, %c0_36] : memref<1x128xf32, #tpu.memory_space<vmem>>, vector<1x128xf32>
    %43 = vector.broadcast %42 : vector<1x128xf32> to vector<8x128xf32>
    %44 = arith.addf %41, %43 : vector<8x128xf32>
    %cst_37 = arith.constant 0.000000e+00 : f32
    %45 = vector.broadcast %cst_37 : f32 to vector<8x128xf32>
    %46 = arith.maximumf %44, %45 : vector<8x128xf32>
    %c0_38 = arith.constant 0 : index
    %c0_39 = arith.constant 0 : index
    %47 = vector.load %arg14[%c0_38, %c0_39] : memref<128x8xf32, #tpu.memory_space<vmem>>, vector<128x8xf32>
    %cst_40 = arith.constant dense<0.000000e+00> : vector<8x8xf32>
    %48 = tpu.matmul %25, %47, %cst_40 {dimension_numbers = #tpu.dot_dimension_numbers<[1], [0], [0], [1], [0, 0, 1, 1], [], []>} : vector<8x128xf32>, vector<128x8xf32>, vector<8x8xf32> -> vector<8x8xf32>
    %c0_41 = arith.constant 0 : index
    %c0_42 = arith.constant 0 : index
    %49 = vector.load %arg15[%c0_41, %c0_42] : memref<128x8xf32, #tpu.memory_space<vmem>>, vector<128x8xf32>
    %cst_43 = arith.constant dense<0.000000e+00> : vector<8x8xf32>
    %50 = tpu.matmul %46, %49, %cst_43 {dimension_numbers = #tpu.dot_dimension_numbers<[1], [0], [0], [1], [0, 0, 1, 1], [], []>} : vector<8x128xf32>, vector<128x8xf32>, vector<8x8xf32> -> vector<8x8xf32>
    %51 = arith.addf %48, %50 : vector<8x8xf32>
    %c0_44 = arith.constant 0 : index
    %c0_45 = arith.constant 0 : index
    %52 = vector.load %arg16[%c0_44, %c0_45] : memref<1x8xf32, #tpu.memory_space<vmem>>, vector<1x8xf32>
    %53 = vector.broadcast %52 : vector<1x8xf32> to vector<8x8xf32>
    %54 = arith.addf %51, %53 : vector<8x8xf32>
    %55 = tpu.iota {dimensions = array<i32: 1>} : vector<8x8xi32>
    %cst_46 = arith.constant -5.000000e+00 : f32
    %cst_47 = arith.constant 5.000000e+00 : f32
    %56 = vector.broadcast %cst_46 : f32 to vector<8x8xf32>
    %57 = arith.maximumf %56, %54 : vector<8x8xf32>
    %58 = vector.broadcast %cst_47 : f32 to vector<8x8xf32>
    %59 = arith.minimumf %58, %57 : vector<8x8xf32>
    %cst_48 = arith.constant 0.000000e+00 : f32
    %60 = vector.broadcast %cst_48 : f32 to vector<8x8xf32>
    %61 = arith.subf %60, %59 : vector<8x8xf32>
    %62 = math.exp %61 : vector<8x8xf32>
    %cst_49 = arith.constant 1.000000e+00 : f32
    %63 = vector.broadcast %cst_49 : f32 to vector<8x8xf32>
    %64 = arith.addf %63, %62 : vector<8x8xf32>
    %65 = tpu.reciprocal %64 {approx = true} : vector<8x8xf32> -> vector<8x8xf32>
    %c6_i32 = arith.constant 6 : i32
    %66 = vector.broadcast %c6_i32 : i32 to vector<8x8xi32>
    %67 = arith.cmpi slt, %55, %66 : vector<8x8xi32>
    %68 = arith.select %67, %65, %54 : vector<8x8xi1>, vector<8x8xf32>
    %c0_50 = arith.constant 0 : index
    %c0_51 = arith.constant 0 : index
    %69 = vector.load %arg17[%c0_50, %c0_51] : memref<8x8xf32, #tpu.memory_space<vmem>>, vector<8x8xf32>
    tpu.vector_store %arg17[%c0_50, %c0_51], %68 {strides = array<i32>} : memref<8x8xf32, #tpu.memory_space<vmem>>, vector<8x8xf32>,
    return
  }
  func.func @transform_0(%arg0: i32) -> (i32, i32) {
    %c0_i32 = arith.constant 0 : i32
    %c0_i32_0 = arith.constant 0 : i32
    return %arg0, %c0_i32 : i32, i32
  }
  func.func @transform_1(%arg0: i32) -> (i32, i32) {
    %c0_i32 = arith.constant 0 : i32
    %c0_i32_0 = arith.constant 0 : i32
    %c0_i32_1 = arith.constant 0 : i32
    return %c0_i32, %c0_i32_0 : i32, i32
  }
  func.func @transform_2(%arg0: i32) -> (i32, i32) {
    %c0_i32 = arith.constant 0 : i32
    %c0_i32_0 = arith.constant 0 : i32
    %c0_i32_1 = arith.constant 0 : i32
    return %c0_i32, %c0_i32_0 : i32, i32
  }
  func.func @transform_3(%arg0: i32) -> (i32, i32) {
    %c0_i32 = arith.constant 0 : i32
    %c0_i32_0 = arith.constant 0 : i32
    %c0_i32_1 = arith.constant 0 : i32
    return %c0_i32, %c0_i32_0 : i32, i32
  }
  func.func @transform_4(%arg0: i32) -> (i32, i32) {
    %c0_i32 = arith.constant 0 : i32
    %c0_i32_0 = arith.constant 0 : i32
    %c0_i32_1 = arith.constant 0 : i32
    return %c0_i32, %c0_i32_0 : i32, i32
  }
  func.func @transform_5(%arg0: i32) -> (i32, i32) {
    %c0_i32 = arith.constant 0 : i32
    %c0_i32_0 = arith.constant 0 : i32
    %c0_i32_1 = arith.constant 0 : i32
    return %c0_i32, %c0_i32_0 : i32, i32
  }
  func.func @transform_6(%arg0: i32) -> (i32, i32) {
    %c0_i32 = arith.constant 0 : i32
    %c0_i32_0 = arith.constant 0 : i32
    %c0_i32_1 = arith.constant 0 : i32
    return %c0_i32, %c0_i32_0 : i32, i32
  }
  func.func @transform_7(%arg0: i32) -> (i32, i32) {
    %c0_i32 = arith.constant 0 : i32
    %c0_i32_0 = arith.constant 0 : i32
    %c0_i32_1 = arith.constant 0 : i32
    return %c0_i32, %c0_i32_0 : i32, i32
  }
  func.func @transform_8(%arg0: i32) -> (i32, i32) {
    %c0_i32 = arith.constant 0 : i32
    %c0_i32_0 = arith.constant 0 : i32
    %c0_i32_1 = arith.constant 0 : i32
    return %c0_i32, %c0_i32_0 : i32, i32
  }
  func.func @transform_9(%arg0: i32) -> (i32, i32) {
    %c0_i32 = arith.constant 0 : i32
    %c0_i32_0 = arith.constant 0 : i32
    %c0_i32_1 = arith.constant 0 : i32
    return %c0_i32, %c0_i32_0 : i32, i32
  }
  func.func @transform_10(%arg0: i32) -> (i32, i32) {
    %c0_i32 = arith.constant 0 : i32
    %c0_i32_0 = arith.constant 0 : i32
    %c0_i32_1 = arith.constant 0 : i32
    return %c0_i32, %c0_i32_0 : i32, i32
  }
  func.func @transform_11(%arg0: i32) -> (i32, i32) {
    %c0_i32 = arith.constant 0 : i32
    %c0_i32_0 = arith.constant 0 : i32
    %c0_i32_1 = arith.constant 0 : i32
    return %c0_i32, %c0_i32_0 : i32, i32
  }
  func.func @transform_12(%arg0: i32) -> (i32, i32) {
    %c0_i32 = arith.constant 0 : i32
    %c0_i32_0 = arith.constant 0 : i32
    %c0_i32_1 = arith.constant 0 : i32
    return %c0_i32, %c0_i32_0 : i32, i32
  }
  func.func @transform_13(%arg0: i32) -> (i32, i32) {
    %c0_i32 = arith.constant 0 : i32
    %c0_i32_0 = arith.constant 0 : i32
    %c0_i32_1 = arith.constant 0 : i32
    return %c0_i32, %c0_i32_0 : i32, i32
  }
  func.func @transform_14(%arg0: i32) -> (i32, i32) {
    %c0_i32 = arith.constant 0 : i32
    %c0_i32_0 = arith.constant 0 : i32
    %c0_i32_1 = arith.constant 0 : i32
    return %c0_i32, %c0_i32_0 : i32, i32
  }
  func.func @transform_15(%arg0: i32) -> (i32, i32) {
    %c0_i32 = arith.constant 0 : i32
    %c0_i32_0 = arith.constant 0 : i32
    %c0_i32_1 = arith.constant 0 : i32
    return %c0_i32, %c0_i32_0 : i32, i32
  }
  func.func @transform_16(%arg0: i32) -> (i32, i32) {
    %c0_i32 = arith.constant 0 : i32
    %c0_i32_0 = arith.constant 0 : i32
    return %arg0, %c0_i32 : i32, i32
  }
}

</mosaic_0001>

<bundles_post_ra>
// kernel: mappo_forward_fused.1
= control target key start
LH: loop header
LB: loop body
LE: loop exit
PB: predicated region body
PF: predicated region fallthrough
CT: control target
= control target key end

     0   :  { %s1882_s0 = inlined_call_operand.hbm [shape: f32[8,16], index: 0, kind: input, shape index: {}]   ;;  %s1883_s1 = inlined_call_operand.vmem [shape: f32[16,128], index: 1, kind: input, shape index: {}]   ;;  %s1884_s2 = inlined_call_operand.hbm [shape: f32[1,128], index: 2, kind: input, shape index: {}]   ;;  %s1885_s3 = inlined_call_operand.vmem [shape: f32[128,128], index: 3, kind: input, shape index: {}]   ;;  %s1886_s4 = inlined_call_operand.hbm [shape: f32[1,128], index: 4, kind: input, shape index: {}]   ;;  %s1887_s5 = inlined_call_operand.vmem [shape: f32[128,128], index: 5, kind: input, shape index: {}]   ;;  %s1888_s6 = inlined_call_operand.hbm [shape: f32[1,128], index: 6, kind: input, shape index: {}]   ;;  %s1889_s7 = inlined_call_operand.hbm [shape: f32[16,128], index: 7, kind: input, shape index: {}]   ;;  %s1890_s8 = inlined_call_operand.hbm [shape: f32[1,128], index: 8, kind: input, shape index: {}]   ;;  %s1891_s9 = inlined_call_operand.hbm [shape: f32[128,128], index: 9, kind: input, shape index: {}]   ;;  %s1892_s10 = inlined_call_operand.vmem [shape: f32[1,128], index: 10, kind: input, shape index: {}]   ;;  %s1893_s11 = inlined_call_operand.hbm [shape: f32[128,128], index: 11, kind: input, shape index: {}]   ;;  %s1894_s12 = inlined_call_operand.vmem [shape: f32[1,128], index: 12, kind: input, shape index: {}]   ;;  %s1895_s13 = inlined_call_operand.vmem [shape: f32[128,8], index: 13, kind: input, shape index: {}]   ;;  %s1896_s14 = inlined_call_operand.vmem [shape: f32[128,8], index: 14, kind: input, shape index: {}]   ;;  %s1897_s15 = inlined_call_operand.vmem [shape: f32[1,8], index: 15, kind: input, shape index: {}]   ;;  %s1898_s16 = inlined_call_operand.vmem [shape: f32[8,8], index: 16, kind: output, shape index: {}]  }
   0x1   :  { %1899 = sst [smem:[#allocation20_spill]] %s1882_s0 }
   0x2   :  { %21 = vsyncpa [#allocation3], 0 }
   0x3   :  { %22 = vsyncpa [#allocation5], 0 }
   0x4   :  { %23 = vsyncpa [#allocation8], 0 }
   0x5   :  { %24 = vsyncpa [#allocation11], 0 }
   0x6   :  { %25 = vsyncpa [#allocation14], 0  ;;  %s1426_s21 = smov [#allocation4]   ;;  %s1427_s23 = smov [#allocation7]  }
   0x7   :  { %s44_s22 = sshll.u32 %s1426_s21, 4  ;;  %s68_s24 = sshll.u32 %s1427_s23, 4  ;;  %s45_s22 = int_to_ptr.vmem [resolvable:$true] %s44_s22  ;;  %s69_s24 = int_to_ptr.vmem [resolvable:$true] %s68_s24 }
   0x8   :  { %s1264_s25 = scalar_lea.vmem %s45_s22, 16  ;;  %s1268_s26 = scalar_lea.vmem %s45_s22, 32 }
   0x9   :  { %p1265_p0 = scmp.ne.s32.totalorder %s45_s22, %s1264_s25  ;;  %p1269_p1 = scmp.lt.s32.totalorder %s45_s22, %s45_s22 }
   0xa   :  { %p1270_p2 = scmp.lt.s32.totalorder %s1268_s26, %s1264_s25 }
   0xc   :  { %p1271_p3 = por %p1270_p2, %p1269_p1 }
   0xe   :  { %p1272_p4 = pnand %p1271_p3, %p1265_p0 }
  0x10   :  { %1275 = shalt.err (!%p1272_p4)
}
  0x11   :  { %47 = dma.hbm_to_vmem [thread:$0]  %s1884_s2, 16, %s45_s22, [#allocation5]  }
  0x12   :  { %s1284_s29 = scalar_lea.vmem %s69_s24, 16  ;;  %s1288_s30 = scalar_lea.vmem %s69_s24, 32 }
  0x13   :  { %p1285_p5 = scmp.ne.s32.totalorder %s69_s24, %s1284_s29  ;;  %p1289_p6 = scmp.lt.s32.totalorder %s69_s24, %s69_s24 }
  0x14   :  { %p1290_p7 = scmp.lt.s32.totalorder %s1288_s30, %s1284_s29 }
  0x16   :  { %p1291_p8 = por %p1290_p7, %p1289_p6 }
  0x18   :  { %p1292_p9 = pnand %p1291_p8, %p1285_p5 }
  0x1a   :  { %1295 = shalt.err (!%p1292_p9)
}
  0x1b   :  { %71 = dma.hbm_to_vmem [thread:$0]  %s1888_s6, 16, %s69_s24, [#allocation8]  }
  0x1c   :  { %s1428_s18 = smov [#allocation10]   ;;  %s1429_s20 = smov [#allocation2]  }
  0x1d   :  { %s90_s19 = sshll.u32 %s1428_s18, 4  ;;  %s32_s21 = sshll.u32 %s1429_s20, 4  ;;  %s91_s19 = int_to_ptr.vmem [resolvable:$true] %s90_s19  ;;  %s33_s21 = int_to_ptr.vmem [resolvable:$true] %s32_s21 }
  0x1e   :  { %s1304_s23 = scalar_lea.vmem %s91_s19, 16  ;;  %s1308_s2 = scalar_lea.vmem %s91_s19, 32 }
  0x1f   :  { %p1305_p10 = scmp.ne.s32.totalorder %s91_s19, %s1304_s23  ;;  %p1309_p11 = scmp.lt.s32.totalorder %s91_s19, %s91_s19 }
  0x20   :  { %p1310_p12 = scmp.lt.s32.totalorder %s1308_s2, %s1304_s23 }
  0x22   :  { %p1311_p13 = por %p1310_p12, %p1309_p11 }
  0x24   :  { %p1312_p0 = pnand %p1311_p13, %p1305_p10 }
  0x26   :  { %1315 = shalt.err (!%p1312_p0)
}
  0x27   :  { %93 = dma.hbm_to_vmem [thread:$0]  %s1890_s8, 16, %s91_s19, [#allocation11]  }
  0x28   :  { %s1324_s26 = scalar_lea.vmem %s33_s21, 128  ;;  %p1329_p2 = scmp.lt.s32.totalorder %s33_s21, %s33_s21 }
  0x29   :  { %p1325_p1 = scmp.ne.s32.totalorder %s33_s21, %s1324_s26  ;;  %p1330_p3 = scmp.lt.s32.totalorder %s1324_s26, %s1324_s26 }
  0x2b   :  { %p1331_p4 = por %p1330_p3, %p1329_p2 }
  0x2d   :  { %p1332_p5 = pnand %p1331_p4, %p1325_p1 }
  0x2f   :  { %1335 = shalt.err (!%p1332_p5)
}
  0x30   :  { %s1900_s27 = sld [smem:[#allocation20_spill]]  ;;  %s1430_s28 = smov [#allocation6]  }
  0x31   :  { %s56_s29 = sshll.u32 %s1430_s28, 4  ;;  %s1431_s30 = smov [#allocation9]   ;;  %s57_s29 = int_to_ptr.vmem [resolvable:$true] %s56_s29 }
  0x32   :  { %s77_s0 = sshll.u32 %s1431_s30, 4  ;;  %s1344_s17 = scalar_lea.vmem %s57_s29, 16  ;;  %s78_s0 = int_to_ptr.vmem [resolvable:$true] %s77_s0 }
  0x33   :  { %p1345_p6 = scmp.ne.s32.totalorder %s57_s29, %s1344_s17  ;;  %s1348_s8 = scalar_lea.vmem %s57_s29, 32 }
  0x34   :  { %p1349_p7 = scmp.lt.s32.totalorder %s57_s29, %s57_s29  ;;  %p1350_p8 = scmp.lt.s32.totalorder %s1348_s8, %s1344_s17 }
  0x36   :  { %35 = dma.hbm_to_vmem [thread:$0]  %s1900_s27, 128, %s33_s21, [#allocation3]  }
  0x37   :  { %p1351_p9 = por %p1350_p8, %p1349_p7 }
  0x39   :  { %p1352_p10 = pnand %p1351_p9, %p1345_p6 }
  0x3b   :  { %1355 = shalt.err (!%p1352_p10)
}
  0x3c   :  { %59 = dma.hbm_to_vmem [thread:$0]  %s1886_s4, 16, %s57_s29, [#allocation5]  }
  0x3d   :  { %s1364_s20 = scalar_lea.vmem %s78_s0, 256  ;;  %p1369_p12 = scmp.lt.s32.totalorder %s78_s0, %s78_s0 }
  0x3e   :  { %p1365_p11 = scmp.ne.s32.totalorder %s78_s0, %s1364_s20  ;;  %p1370_p13 = scmp.lt.s32.totalorder %s1364_s20, %s1364_s20 }
  0x40   :  { %p1371_p0 = por %p1370_p13, %p1369_p12 }
  0x42   :  { %p1372_p1 = pnand %p1371_p0, %p1365_p11 }
  0x44   :  { %1375 = shalt.err (!%p1372_p1)
}
  0x45   :  { %s1432_s21 = smov 128   ;;  %s1433_s23 = smov 8  }
  0x46   :  { %83 = dma.hbm_to_vmem [thread:$0]  %s1889_s7, 256, %s78_s0, [#allocation8], %s1432_s21, %s1432_s21, %s1433_s23  }
  0x47   :  { %s1434_s25 = smov [#allocation12]   ;;  %s1435_s6 = smov [#allocation13]  }
  0x48   :  { %s99_s26 = sshll.u32 %s1434_s25, 4  ;;  %s113_s24 = sshll.u32 %s1435_s6, 4  ;;  %s100_s26 = int_to_ptr.vmem [resolvable:$true] %s99_s26  ;;  %s114_s24 = int_to_ptr.vmem [resolvable:$true] %s113_s24 }
  0x49   :  { %s1384_s4 = scalar_lea.vmem %s100_s26, 2048  ;;  %p1389_p3 = scmp.lt.s32.totalorder %s100_s26, %s100_s26 }
  0x4a   :  { %p1385_p2 = scmp.ne.s32.totalorder %s100_s26, %s1384_s4  ;;  %p1390_p4 = scmp.lt.s32.totalorder %s1384_s4, %s1384_s4 }
  0x4c   :  { %p1391_p5 = por %p1390_p4, %p1389_p3 }
  0x4e   :  { %p1392_p6 = pnand %p1391_p5, %p1385_p2 }
  0x50   :  { %1395 = shalt.err (!%p1392_p6)
}
  0x51   :  { %105 = dma.hbm_to_vmem [thread:$0]  %s1891_s9, 2048, %s100_s26, [#allocation11], %s1432_s21, %s1432_s21, %s1433_s23  }
  0x52   :  { %s1404_s29 = scalar_lea.vmem %s114_s24, 2048  ;;  %p1409_p8 = scmp.lt.s32.totalorder %s114_s24, %s114_s24 }
  0x53   :  { %p1405_p7 = scmp.ne.s32.totalorder %s114_s24, %s1404_s29  ;;  %p1410_p9 = scmp.lt.s32.totalorder %s1404_s29, %s1404_s29 }
  0x55   :  { %p1411_p10 = por %p1410_p9, %p1409_p8 }
  0x57   :  { %p1412_p11 = pnand %p1411_p10, %p1405_p7 }
  0x59   :  { %1415 = shalt.err (!%p1412_p11)
}
  0x5a   :  { %119 = dma.hbm_to_vmem [thread:$0]  %s1893_s11, 2048, %s114_s24, [#allocation14], %s1432_s21, %s1432_s21, %s1433_s23  }
  0x5b   :  { %1416 = dma.done.wait [#allocation3], 128  }
  0x5c   :  { %1417 = vsyncadd [#allocation3], 4294967168 }
  0x5d   :  { %1418 = dma.done.wait [#allocation5], 32  }
  0x5e   :  { %1419 = vsyncadd [#allocation5], 4294967264 }
  0x5f   :  { %1420 = dma.done.wait [#allocation8], 272  }
  0x60   :  { %1421 = vsyncadd [#allocation8], 4294967024 }
  0x61   :  { %1422 = dma.done.wait [#allocation11], 2064  }
  0x62   :  { %1423 = vsyncadd [#allocation11], 4294965232 }
  0x63   :  { %1424 = dma.done.wait [#allocation14], 2048  }
  0x64   :  { %1425 = vsyncadd [#allocation14], 4294965248  ;;  %v1436_v0 = vmov 0.0   ;;  %vm1437_vm0 = vmmov 0   ;;  %v156_v1 = vld [vmem:[%s1883_s1 + $0x8] sm:$0xff]  ;;  %v155_v2 = vld [vmem:[%s1883_s1] sm:$0xff] }
  0x65   :  { %1016 = vmatprep.subr.mxu0 %v1436_v0  ;;  %1020 = vmatprep.mubr.msk.f32.mxu0 %vm1437_vm0, %v1436_v0  ;;  %v1559_v3 = vld [vmem:[#allocation2] sm:$0xff]  ;;  %vm164_vm1 = vcmask 130048   ;;  %v254_v5 = vld [vmem:[%s1885_s3 + $0x78] sm:$0xff]  ;;  %v253_v6 = vld [vmem:[%s1885_s3 + $0x70] sm:$0xff]  ;;  %vm886_vm3 = vcmask 64512  }
  0x66   :  { %1023 = vmatprep.subr.mxu1 %v1436_v0  ;;  %1055 = vmatprep.mubr.msk.f32.mxu1 %vm1437_vm0, %v1436_v0  ;;  %v897_v4 = vclamps-f32 %v1559_v3, 10.0  ;;  %v252_v7 = vld [vmem:[%s1885_s3 + $0x68] sm:$0xff]  ;;  %v251_v8 = vld [vmem:[%s1885_s3 + $0x60] sm:$0xff]  ;;  %v250_v9 = vld [vmem:[%s1885_s3 + $0x58] sm:$0xff] }
  0x67   :  { %1017 = vmatpush3.msra.mxu0 %v156_v1  ;;  %1024 = vmatpush3.msra.mxu1 %v254_v5  ;;  %v249_v10 = vld [vmem:[%s1885_s3 + $0x50] sm:$0xff]  ;;  %v248_v11 = vld [vmem:[%s1885_s3 + $0x48] sm:$0xff]  ;;  %v247_v12 = vld [vmem:[%s1885_s3 + $0x40] sm:$0xff] }
  0x68   :  { %1018 = vmatprep.subr.mxu0 %v1436_v0  ;;  %1025 = vmatprep.subr.mxu1 %v1436_v0  ;;  %v246_v13 = vld [vmem:[%s1885_s3 + $0x38] sm:$0xff]  ;;  %v245_v14 = vld [vmem:[%s1885_s3 + $0x30] sm:$0xff]  ;;  %v244_v15 = vld [vmem:[%s1885_s3 + $0x28] sm:$0xff] }
  0x69   :  { %1019 = vmatpush3.msra.mxu0 %v155_v2  ;;  %1026 = vmatpush3.msra.mxu1 %v253_v6  ;;  %v243_v16 = vld [vmem:[%s1885_s3 + $0x20] sm:$0xff]  ;;  %v242_v17 = vld [vmem:[%s1885_s3 + $0x18] sm:$0xff]  ;;  %v241_v18 = vld [vmem:[%s1885_s3 + $0x10] sm:$0xff] }
  0x6a   :  { %1021 = vmatmul.mubr.msk.f32.vlgmr.msra.gmra.mxu0 %vm164_vm1, %v897_v4  ;;  %1027 = vmatprep.subr.mxu1 %v1436_v0  ;;  %v240_v19 = vld [vmem:[%s1885_s3 + $0x8] sm:$0xff]  ;;  %v239_v20 = vld [vmem:[%s1885_s3] sm:$0xff]  ;;  %v348_v21 = vld [vmem:[%s1887_s5 + $0x78] sm:$0xff] }
  0x6b   :  { %1058 = vmatprep.subr.mxu0 %v1436_v0  ;;  %1028 = vmatpush3.msra.mxu1 %v252_v7  ;;  %v347_v22 = vld [vmem:[%s1887_s5 + $0x70] sm:$0xff]  ;;  %v346_v23 = vld [vmem:[%s1887_s5 + $0x68] sm:$0xff]  ;;  %v345_v24 = vld [vmem:[%s1887_s5 + $0x60] sm:$0xff] }
  0x6c   :  { %1090 = vmatprep.mubr.msk.f32.mxu0 %vm1437_vm0, %v1436_v0  ;;  %1029 = vmatprep.subr.mxu1 %v1436_v0  ;;  %v344_v25 = vld [vmem:[%s1887_s5 + $0x58] sm:$0xff]  ;;  %v343_v26 = vld [vmem:[%s1887_s5 + $0x50] sm:$0xff]  ;;  %v342_v27 = vld [vmem:[%s1887_s5 + $0x48] sm:$0xff] }
  0x6d   :  { %1030 = vmatpush3.msra.mxu1 %v251_v8  ;;  %1059 = vmatpush3.msra.mxu0 %v348_v21  ;;  %v341_v28 = vld [vmem:[%s1887_s5 + $0x40] sm:$0xff]  ;;  %v340_v29 = vld [vmem:[%s1887_s5 + $0x38] sm:$0xff]  ;;  %v339_v30 = vld [vmem:[%s1887_s5 + $0x30] sm:$0xff] }
  0x6e   :  { %1031 = vmatprep.subr.mxu1 %v1436_v0  ;;  %1060 = vmatprep.subr.mxu0 %v1436_v0  ;;  %v338_v31 = vld [vmem:[%s1887_s5 + $0x28] sm:$0xff]  ;;  %v337_v32 = vld [vmem:[%s1887_s5 + $0x20] sm:$0xff]  ;;  %v336_v33 = vld [vmem:[%s1887_s5 + $0x18] sm:$0xff] }
  0x6f   :  { %1032 = vmatpush3.msra.mxu1 %v250_v9  ;;  %1061 = vmatpush3.msra.mxu0 %v347_v22  ;;  %v335_v34 = vld [vmem:[%s1887_s5 + $0x10] sm:$0xff]  ;;  %v898_v35 = vld [vmem:[#allocation4] ss:$0 sm:$0xff]  ;;  %v333_v43 = vld [vmem:[%s1887_s5] sm:$0xff] }
  0x70   :  { %1033 = vmatprep.subr.mxu1 %v1436_v0  ;;  %1062 = vmatprep.subr.mxu0 %v1436_v0  ;;  %v428_v40 = vld [vmem:[#allocation9 + $0x8] sm:$0xff]  ;;  %v427_v41 = vld [vmem:[#allocation9] sm:$0xff]  ;;  %v900_v44 = vld [vmem:[#allocation6] ss:$0 sm:$0xff] }
  0x71   :  { %1034 = vmatpush3.msra.mxu1 %v249_v10  ;;  %1063 = vmatpush3.msra.mxu0 %v346_v23  ;;  %v334_v42 = vld [vmem:[%s1887_s5 + $0x8] sm:$0xff]  ;;  %v522_v49 = vld [vmem:[#allocation12 + $0x78] sm:$0xff]  ;;  %v521_v51 = vld [vmem:[#allocation12 + $0x70] sm:$0xff] }
  0x72   :  { %1035 = vmatprep.subr.mxu1 %v1436_v0  ;;  %1064 = vmatprep.subr.mxu0 %v1436_v0  ;;  %v520_v53 = vld [vmem:[#allocation12 + $0x68] sm:$0xff]  ;;  %v519_v54 = vld [vmem:[#allocation12 + $0x60] sm:$0xff]  ;;  %v518_v55 = vld [vmem:[#allocation12 + $0x58] sm:$0xff] }
  0x73   :  { %1036 = vmatpush3.msra.mxu1 %v248_v11  ;;  %1065 = vmatpush3.msra.mxu0 %v345_v24  ;;  %v517_v56 = vld [vmem:[#allocation12 + $0x50] sm:$0xff]  ;;  %v516_v57 = vld [vmem:[#allocation12 + $0x48] sm:$0xff]  ;;  %v515_v58 = vld [vmem:[#allocation12 + $0x40] sm:$0xff] }
  0x74   :  { %1037 = vmatprep.subr.mxu1 %v1436_v0  ;;  %1066 = vmatprep.subr.mxu0 %v1436_v0  ;;  %v514_v59 = vld [vmem:[#allocation12 + $0x38] sm:$0xff]  ;;  %v513_v60 = vld [vmem:[#allocation12 + $0x30] sm:$0xff]  ;;  %v512_v61 = vld [vmem:[#allocation12 + $0x28] sm:$0xff] }
  0x75   :  { %1038 = vmatpush3.msra.mxu1 %v247_v12  ;;  %1067 = vmatpush3.msra.mxu0 %v344_v25  ;;  %v511_v62 = vld [vmem:[#allocation12 + $0x20] sm:$0xff]  ;;  %v902_v63 = vld [vmem:[#allocation10] ss:$0 sm:$0xff]  ;;  %v509_v3 = vld [vmem:[#allocation12 + $0x10] sm:$0xff] }
  0x76   :  { %1039 = vmatprep.subr.mxu1 %v1436_v0  ;;  %1068 = vmatprep.subr.mxu0 %v1436_v0  ;;  %v510_v1 = vld [vmem:[#allocation12 + $0x18] sm:$0xff]  ;;  %v507_v6 = vld [vmem:[#allocation12] sm:$0xff]  ;;  %v615_v8 = vld [vmem:[#allocation13 + $0x70] sm:$0xff] }
  0x77   :  { %1040 = vmatpush3.msra.mxu1 %v246_v13  ;;  %1069 = vmatpush3.msra.mxu0 %v343_v26  ;;  %v616_v7 = vld [vmem:[#allocation13 + $0x78] sm:$0xff]  ;;  %v614_v9 = vld [vmem:[#allocation13 + $0x68] sm:$0xff]  ;;  %v613_v10 = vld [vmem:[#allocation13 + $0x60] sm:$0xff] }
  0x78   :  { %1041 = vmatprep.subr.mxu1 %v1436_v0  ;;  %1070 = vmatprep.subr.mxu0 %v1436_v0  ;;  %v612_v11 = vld [vmem:[#allocation13 + $0x58] sm:$0xff]  ;;  %v611_v12 = vld [vmem:[#allocation13 + $0x50] sm:$0xff]  ;;  %v610_v13 = vld [vmem:[#allocation13 + $0x48] sm:$0xff] }
  0x79   :  { %1042 = vmatpush3.msra.mxu1 %v245_v14  ;;  %1071 = vmatpush3.msra.mxu0 %v342_v27  ;;  %v609_v14 = vld [vmem:[#allocation13 + $0x40] sm:$0xff]  ;;  %v602_v21 = vld [vmem:[#allocation13 + $0x8] sm:$0xff]  ;;  %v726_v23 = vld [vmem:[%s1896_s14 + $0x78] sm:$0xff] }
  0x7a   :  { %1043 = vmatprep.subr.mxu1 %v1436_v0  ;;  %1072 = vmatprep.subr.mxu0 %v1436_v0  ;;  %v601_v22 = vld [vmem:[#allocation13] sm:$0xff]  ;;  %v725_v24 = vld [vmem:[%s1896_s14 + $0x70] sm:$0xff]  ;;  %v724_v25 = vld [vmem:[%s1896_s14 + $0x68] sm:$0xff] }
  0x7b   :  { %1044 = vmatpush3.msra.mxu1 %v244_v15  ;;  %1073 = vmatpush3.msra.mxu0 %v341_v28  ;;  %v608_v15 = vld [vmem:[#allocation13 + $0x38] sm:$0xff]  ;;  %v723_v26 = vld [vmem:[%s1896_s14 + $0x60] sm:$0xff]  ;;  %v721_v28 = vld [vmem:[%s1896_s14 + $0x50] sm:$0xff] }
  0x7c   :  { %1045 = vmatprep.subr.mxu1 %v1436_v0  ;;  %1074 = vmatprep.subr.mxu0 %v1436_v0  ;;  %v722_v27 = vld [vmem:[%s1896_s14 + $0x58] sm:$0xff] }
  0x7d   :  { %1046 = vmatpush3.msra.mxu1 %v243_v16  ;;  %1075 = vmatpush3.msra.mxu0 %v340_v29  ;;  %v607_v16 = vld [vmem:[#allocation13 + $0x30] sm:$0xff]  ;;  %v720_v29 = vld [vmem:[%s1896_s14 + $0x48] sm:$0xff] }
  0x7e   :  { %1047 = vmatprep.subr.mxu1 %v1436_v0  ;;  %1076 = vmatprep.subr.mxu0 %v1436_v0 }
  0x7f   :  { %1048 = vmatpush3.msra.mxu1 %v242_v17  ;;  %1077 = vmatpush3.msra.mxu0 %v339_v30  ;;  %v606_v17 = vld [vmem:[#allocation13 + $0x28] sm:$0xff]  ;;  %v719_v30 = vld [vmem:[%s1896_s14 + $0x40] sm:$0xff] }
  0x80   :  { %1049 = vmatprep.subr.mxu1 %v1436_v0  ;;  %1078 = vmatprep.subr.mxu0 %v1436_v0 }
  0x81   :  { %1050 = vmatpush3.msra.mxu1 %v241_v18  ;;  %1079 = vmatpush3.msra.mxu0 %v338_v31  ;;  %v605_v18 = vld [vmem:[#allocation13 + $0x20] sm:$0xff]  ;;  %v718_v31 = vld [vmem:[%s1896_s14 + $0x38] sm:$0xff] }
  0x82   :  { %1051 = vmatprep.subr.mxu1 %v1436_v0  ;;  %1080 = vmatprep.subr.mxu0 %v1436_v0 }
  0x83   :  { %1052 = vmatpush3.msra.mxu1 %v240_v19  ;;  %1081 = vmatpush3.msra.mxu0 %v337_v32  ;;  %v604_v19 = vld [vmem:[#allocation13 + $0x18] sm:$0xff]  ;;  %v717_v32 = vld [vmem:[%s1896_s14 + $0x30] sm:$0xff] }
  0x84   :  { %1053 = vmatprep.subr.mxu1 %v1436_v0  ;;  %1082 = vmatprep.subr.mxu0 %v1436_v0 }
  0x85   :  { %1054 = vmatpush3.msra.mxu1 %v239_v20  ;;  %1083 = vmatpush3.msra.mxu0 %v336_v33  ;;  %v603_v20 = vld [vmem:[#allocation13 + $0x10] sm:$0xff]  ;;  %v716_v33 = vld [vmem:[%s1896_s14 + $0x28] sm:$0xff] }
  0x86   :  { %1093 = vmatprep.subr.mxu1 %v1436_v0  ;;  %1084 = vmatprep.subr.mxu0 %v1436_v0 }
  0x87   :  { %1085 = vmatpush3.msra.mxu0 %v335_v34  ;;  %v715_v34 = vld [vmem:[%s1896_s14 + $0x20] sm:$0xff] }
  0x88   :  { %1086 = vmatprep.subr.mxu0 %v1436_v0 }
  0x89   :  { %1087 = vmatpush3.msra.mxu0 %v334_v42 }
  0x8a   :  { %1088 = vmatprep.subr.mxu0 %v1436_v0 }
  0x8b   :  { %1089 = vmatpush3.msra.mxu0 %v333_v43  ;;  %v710_v43 = vld [vmem:[%s1895_s13 + $0x78] sm:$0xff] }
  0x8c   :  { %1100 = vmatprep.subr.mxu0 %v1436_v0 }
 0x12a   :  { %v234_v36 = vpop.f32.mrf.mxu0 }
 0x12b   :  { %v235_v37 = vadd.f32 %v898_v35, %v234_v36  ;;  %v714_v35 = vld [vmem:[%s1896_s14 + $0x18] sm:$0xff] }
 0x12c   :  { %v1022_v38 = vpop.f32.mrf.mxu0 }
 0x12d   :  { %v238_v39 = vmax.f32 %v235_v37, 0.0  ;;  %v904_v38 = vld [vmem:[%s1892_s10] ss:$0 sm:$0xff] }
 0x12f   :  { %1056 = vmatmul.mubr.f32.vlgmr.msra.gmra.mxu1 %v238_v39 }
 0x130   :  { %1094 = vmatpush3.msra.mxu1 %v428_v40  ;;  %1097 = vmatprep.mubr.msk.f32.mxu1 %vm1437_vm0, %v1436_v0 }
 0x131   :  { %1095 = vmatprep.subr.mxu1 %v1436_v0 }
 0x132   :  { %1096 = vmatpush3.msra.mxu1 %v427_v41 }
 0x133   :  { %1098 = vmatmul.mubr.msk.f32.vlgmr.msra.gmra.mxu1 %vm164_vm1, %v897_v4  ;;  %1135 = vmatprep.subr.mxu1 %v1436_v0  ;;  %v508_v4 = vld [vmem:[#allocation12 + $0x8] sm:$0xff] }
 0x134   :  { %1167 = vmatprep.mubr.msk.f32.mxu1 %vm1437_vm0, %v1436_v0  ;;  %1136 = vmatpush3.msra.mxu1 %v616_v7 }
 0x135   :  { %1137 = vmatprep.subr.mxu1 %v1436_v0 }
 0x136   :  { %1138 = vmatpush3.msra.mxu1 %v615_v8 }
 0x137   :  { %1139 = vmatprep.subr.mxu1 %v1436_v0 }
 0x138   :  { %1140 = vmatpush3.msra.mxu1 %v614_v9 }
 0x139   :  { %1141 = vmatprep.subr.mxu1 %v1436_v0 }
 0x13a   :  { %1142 = vmatpush3.msra.mxu1 %v613_v10  ;;  %v906_v10 = vld [vmem:[%s1897_s15] ss:$0 sm:$0xff] }
 0x13b   :  { %1143 = vmatprep.subr.mxu1 %v1436_v0 }
 0x13c   :  { %1144 = vmatpush3.msra.mxu1 %v612_v11 }
 0x13d   :  { %1145 = vmatprep.subr.mxu1 %v1436_v0 }
 0x13e   :  { %1146 = vmatpush3.msra.mxu1 %v611_v12 }
 0x13f   :  { %1147 = vmatprep.subr.mxu1 %v1436_v0 }
 0x140   :  { %1148 = vmatpush3.msra.mxu1 %v610_v13 }
 0x141   :  { %1149 = vmatprep.subr.mxu1 %v1436_v0 }
 0x142   :  { %1150 = vmatpush3.msra.mxu1 %v609_v14 }
 0x143   :  { %1151 = vmatprep.subr.mxu1 %v1436_v0 }
 0x144   :  { %1152 = vmatpush3.msra.mxu1 %v608_v15 }
 0x145   :  { %1153 = vmatprep.subr.mxu1 %v1436_v0 }
 0x146   :  { %1154 = vmatpush3.msra.mxu1 %v607_v16 }
 0x147   :  { %1155 = vmatprep.subr.mxu1 %v1436_v0 }
 0x148   :  { %1156 = vmatpush3.msra.mxu1 %v606_v17 }
 0x149   :  { %1157 = vmatprep.subr.mxu1 %v1436_v0 }
 0x14a   :  { %1158 = vmatpush3.msra.mxu1 %v605_v18  ;;  %v875_v18 = vlaneseq }
 0x14b   :  { %1159 = vmatprep.subr.mxu1 %v1436_v0 }
 0x14c   :  { %1160 = vmatpush3.msra.mxu1 %v604_v19  ;;  %v876_v19 = vand.u32 127, %v875_v18 }
 0x14d   :  { %1161 = vmatprep.subr.mxu1 %v1436_v0 }
 0x14e   :  { %1162 = vmatpush3.msra.mxu1 %v603_v20  ;;  %vm884_vm2 = vcmp.lt.s32.totalorder %v876_v19, 6 }
 0x14f   :  { %1163 = vmatprep.subr.mxu1 %v1436_v0 }
 0x150   :  { %1164 = vmatpush3.msra.mxu1 %v602_v21 }
 0x151   :  { %1165 = vmatprep.subr.mxu1 %v1436_v0 }
 0x152   :  { %1166 = vmatpush3.msra.mxu1 %v601_v22 }
 0x153   :  { %1205 = vmatprep.subr.mxu1 %v1436_v0 }
 0x1ef   :  { %v328_v45 = vpop.f32.mrf.mxu1 }
 0x1f0   :  { %v329_v46 = vadd.f32 %v900_v44, %v328_v45  ;;  %v709_v44 = vld [vmem:[%s1895_s13 + $0x70] sm:$0xff]  ;;  %v708_v45 = vld [vmem:[%s1895_s13 + $0x68] sm:$0xff] }
 0x1f1   :  { %v1057_v47 = vpop.f32.mrf.mxu1 }
 0x1f2   :  { %v332_v48 = vmax.f32 %v329_v46, 0.0  ;;  %v707_v46 = vld [vmem:[%s1895_s13 + $0x60] sm:$0xff]  ;;  %v706_v47 = vld [vmem:[%s1895_s13 + $0x58] sm:$0xff] }
 0x1f3   :  { %v502_v50 = vpop.f32.mrf.mxu1 }
 0x1f4   :  { %1091 = vmatmul.mubr.f32.vlgmr.msra.gmra.mxu0 %v332_v48  ;;  %v503_v2 = vadd.f32 %v902_v63, %v502_v50  ;;  %v705_v48 = vld [vmem:[%s1895_s13 + $0x50] sm:$0xff]  ;;  %v703_v50 = vld [vmem:[%s1895_s13 + $0x40] sm:$0xff]  ;;  %v712_v63 = vld [vmem:[%s1896_s14 + $0x8] sm:$0xff] }
 0x1f5   :  { %1101 = vmatpush3.msra.mxu0 %v522_v49  ;;  %v1099_v52 = vpop.f32.mrf.mxu1  ;;  %1132 = vmatprep.mubr.msk.f32.mxu0 %vm1437_vm0, %v1436_v0  ;;  %v704_v49 = vld [vmem:[%s1895_s13 + $0x48] sm:$0xff] }
 0x1f6   :  { %1102 = vmatprep.subr.mxu0 %v1436_v0  ;;  %v506_v5 = vmax.f32 %v503_v2, 0.0  ;;  %v701_v52 = vld [vmem:[%s1895_s13 + $0x30] sm:$0xff]  ;;  %v905_v2 = vld [vmem:[%s1894_s12] ss:$0 sm:$0xff] }
 0x1f7   :  { %1103 = vmatpush3.msra.mxu0 %v521_v51  ;;  %v702_v51 = vld [vmem:[%s1895_s13 + $0x38] sm:$0xff] }
 0x1f8   :  { %1104 = vmatprep.subr.mxu0 %v1436_v0 }
 0x1f9   :  { %1105 = vmatpush3.msra.mxu0 %v520_v53  ;;  %v700_v53 = vld [vmem:[%s1895_s13 + $0x28] sm:$0xff] }
 0x1fa   :  { %1106 = vmatprep.subr.mxu0 %v1436_v0 }
 0x1fb   :  { %1107 = vmatpush3.msra.mxu0 %v519_v54  ;;  %v699_v54 = vld [vmem:[%s1895_s13 + $0x20] sm:$0xff] }
 0x1fc   :  { %1108 = vmatprep.subr.mxu0 %v1436_v0 }
 0x1fd   :  { %1109 = vmatpush3.msra.mxu0 %v518_v55  ;;  %v698_v55 = vld [vmem:[%s1895_s13 + $0x18] sm:$0xff] }
 0x1fe   :  { %1110 = vmatprep.subr.mxu0 %v1436_v0 }
 0x1ff   :  { %1111 = vmatpush3.msra.mxu0 %v517_v56  ;;  %v901_v56 = vld [vmem:[#allocation7] ss:$0 sm:$0xff] }
 0x200   :  { %1112 = vmatprep.subr.mxu0 %v1436_v0 }
 0x201   :  { %1113 = vmatpush3.msra.mxu0 %v516_v57  ;;  %v697_v57 = vld [vmem:[%s1895_s13 + $0x10] sm:$0xff] }
 0x202   :  { %1114 = vmatprep.subr.mxu0 %v1436_v0 }
 0x203   :  { %1115 = vmatpush3.msra.mxu0 %v515_v58 }
 0x204   :  { %1116 = vmatprep.subr.mxu0 %v1436_v0 }
 0x205   :  { %1117 = vmatpush3.msra.mxu0 %v514_v59  ;;  %v696_v59 = vld [vmem:[%s1895_s13 + $0x8] sm:$0xff] }
 0x206   :  { %1118 = vmatprep.subr.mxu0 %v1436_v0 }
 0x207   :  { %1119 = vmatpush3.msra.mxu0 %v513_v60  ;;  %v695_v60 = vld [vmem:[%s1895_s13] sm:$0xff] }
 0x208   :  { %1120 = vmatprep.subr.mxu0 %v1436_v0 }
 0x209   :  { %1121 = vmatpush3.msra.mxu0 %v512_v61 }
 0x20a   :  { %1122 = vmatprep.subr.mxu0 %v1436_v0 }
 0x20b   :  { %1123 = vmatpush3.msra.mxu0 %v511_v62  ;;  %v713_v62 = vld [vmem:[%s1896_s14 + $0x10] sm:$0xff] }
 0x20c   :  { %1124 = vmatprep.subr.mxu0 %v1436_v0 }
 0x20d   :  { %1125 = vmatpush3.msra.mxu0 %v510_v1  ;;  %v711_v1 = vld [vmem:[%s1896_s14] sm:$0xff] }
 0x20e   :  { %1126 = vmatprep.subr.mxu0 %v1436_v0 }
 0x20f   :  { %1127 = vmatpush3.msra.mxu0 %v509_v3 }
 0x210   :  { %1128 = vmatprep.subr.mxu0 %v1436_v0 }
 0x211   :  { %1129 = vmatpush3.msra.mxu0 %v508_v4 }
 0x212   :  { %1130 = vmatprep.subr.mxu0 %v1436_v0 }
 0x213   :  { %1131 = vmatpush3.msra.mxu0 %v507_v6 }
 0x214   :  { %1133 = vmatmul.mubr.f32.vlgmr.msra.gmra.mxu0 %v506_v5  ;;  %1170 = vmatprep.subr.mxu0 %v1436_v0 }
 0x215   :  { %1202 = vmatprep.mubr.msk.f32.mxu0 %vm1437_vm0, %v1436_v0  ;;  %1171 = vmatpush3.msra.mxu0 %v726_v23 }
 0x216   :  { %1172 = vmatprep.subr.mxu0 %v1436_v0 }
 0x217   :  { %1173 = vmatpush3.msra.mxu0 %v725_v24 }
 0x218   :  { %1174 = vmatprep.subr.mxu0 %v1436_v0 }
 0x219   :  { %1175 = vmatpush3.msra.mxu0 %v724_v25 }
 0x21a   :  { %1176 = vmatprep.subr.mxu0 %v1436_v0 }
 0x21b   :  { %1177 = vmatpush3.msra.mxu0 %v723_v26 }
 0x21c   :  { %1178 = vmatprep.subr.mxu0 %v1436_v0 }
 0x21d   :  { %1179 = vmatpush3.msra.mxu0 %v722_v27 }
 0x21e   :  { %1180 = vmatprep.subr.mxu0 %v1436_v0 }
 0x21f   :  { %1181 = vmatpush3.msra.mxu0 %v721_v28 }
 0x220   :  { %1182 = vmatprep.subr.mxu0 %v1436_v0 }
 0x221   :  { %1183 = vmatpush3.msra.mxu0 %v720_v29 }
 0x222   :  { %1184 = vmatprep.subr.mxu0 %v1436_v0 }
 0x223   :  { %1185 = vmatpush3.msra.mxu0 %v719_v30 }
 0x224   :  { %1186 = vmatprep.subr.mxu0 %v1436_v0 }
 0x225   :  { %1187 = vmatpush3.msra.mxu0 %v718_v31 }
 0x226   :  { %1188 = vmatprep.subr.mxu0 %v1436_v0 }
 0x227   :  { %1189 = vmatpush3.msra.mxu0 %v717_v32 }
 0x228   :  { %1190 = vmatprep.subr.mxu0 %v1436_v0 }
 0x229   :  { %1191 = vmatpush3.msra.mxu0 %v716_v33 }
 0x22a   :  { %1192 = vmatprep.subr.mxu0 %v1436_v0 }
 0x22b   :  { %1193 = vmatpush3.msra.mxu0 %v715_v34 }
 0x22c   :  { %1194 = vmatprep.subr.mxu0 %v1436_v0 }
 0x22d   :  { %1195 = vmatpush3.msra.mxu0 %v714_v35 }
 0x22e   :  { %1196 = vmatprep.subr.mxu0 %v1436_v0 }
 0x22f   :  { %1197 = vmatpush3.msra.mxu0 %v713_v62 }
 0x230   :  { %1198 = vmatprep.subr.mxu0 %v1436_v0 }
 0x231   :  { %1199 = vmatpush3.msra.mxu0 %v712_v63 }
 0x232   :  { %1200 = vmatprep.subr.mxu0 %v1436_v0 }
 0x233   :  { %1201 = vmatpush3.msra.mxu0 %v711_v1 }
 0x2b4   :  { %v422_v36 = vpop.f32.mrf.mxu0 }
 0x2b5   :  { %v423_v58 = vadd.f32 %v901_v56, %v422_v36 }
 0x2b6   :  { %v1092_v37 = vpop.f32.mrf.mxu0 }
 0x2b7   :  { %v426_v61 = vmax.f32 %v423_v58, 0.0 }
 0x2d4   :  { %v596_v39 = vpop.f32.mrf.mxu0 }
 0x2d5   :  { %v597_v40 = vadd.f32 %v904_v38, %v596_v39 }
 0x2d6   :  { %v1134_v41 = vpop.f32.mrf.mxu0 }
 0x2d7   :  { %v600_v42 = vmax.f32 %v597_v40, 0.0 }
 0x2d9   :  { %1168 = vmatmul.mubr.f32.vlgmr.msra.gmra.mxu1 %v600_v42 }
 0x2da   :  { %1206 = vmatpush3.msra.mxu1 %v710_v43  ;;  %1237 = vmatprep.mubr.msk.f32.mxu1 %vm1437_vm0, %v1436_v0 }
 0x2db   :  { %1207 = vmatprep.subr.mxu1 %v1436_v0 }
 0x2dc   :  { %1208 = vmatpush3.msra.mxu1 %v709_v44 }
 0x2dd   :  { %1209 = vmatprep.subr.mxu1 %v1436_v0 }
 0x2de   :  { %1210 = vmatpush3.msra.mxu1 %v708_v45 }
 0x2df   :  { %1211 = vmatprep.subr.mxu1 %v1436_v0 }
 0x2e0   :  { %1212 = vmatpush3.msra.mxu1 %v707_v46 }
 0x2e1   :  { %1213 = vmatprep.subr.mxu1 %v1436_v0 }
 0x2e2   :  { %1214 = vmatpush3.msra.mxu1 %v706_v47 }
 0x2e3   :  { %1215 = vmatprep.subr.mxu1 %v1436_v0 }
 0x2e4   :  { %1216 = vmatpush3.msra.mxu1 %v705_v48 }
 0x2e5   :  { %1217 = vmatprep.subr.mxu1 %v1436_v0 }
 0x2e6   :  { %1218 = vmatpush3.msra.mxu1 %v704_v49 }
 0x2e7   :  { %1219 = vmatprep.subr.mxu1 %v1436_v0 }
 0x2e8   :  { %1220 = vmatpush3.msra.mxu1 %v703_v50 }
 0x2e9   :  { %1221 = vmatprep.subr.mxu1 %v1436_v0 }
 0x2ea   :  { %1222 = vmatpush3.msra.mxu1 %v702_v51 }
 0x2eb   :  { %1223 = vmatprep.subr.mxu1 %v1436_v0 }
 0x2ec   :  { %1224 = vmatpush3.msra.mxu1 %v701_v52 }
 0x2ed   :  { %1225 = vmatprep.subr.mxu1 %v1436_v0 }
 0x2ee   :  { %1226 = vmatpush3.msra.mxu1 %v700_v53 }
 0x2ef   :  { %1227 = vmatprep.subr.mxu1 %v1436_v0 }
 0x2f0   :  { %1228 = vmatpush3.msra.mxu1 %v699_v54 }
 0x2f1   :  { %1229 = vmatprep.subr.mxu1 %v1436_v0 }
 0x2f2   :  { %1230 = vmatpush3.msra.mxu1 %v698_v55 }
 0x2f3   :  { %1231 = vmatprep.subr.mxu1 %v1436_v0 }
 0x2f4   :  { %1232 = vmatpush3.msra.mxu1 %v697_v57 }
 0x2f5   :  { %1233 = vmatprep.subr.mxu1 %v1436_v0 }
 0x2f6   :  { %1234 = vmatpush3.msra.mxu1 %v696_v59 }
 0x2f7   :  { %1235 = vmatprep.subr.mxu1 %v1436_v0 }
 0x2f8   :  { %1236 = vmatpush3.msra.mxu1 %v695_v60 }
 0x2f9   :  { %1238 = vmatmul.mubr.f32.vlgmr.msra.gmra.mxu1 %v426_v61 }
 0x399   :  { %v690_v3 = vpop.f32.mrf.mxu1 }
 0x39a   :  { %v691_v4 = vadd.f32 %v905_v2, %v690_v3 }
 0x39b   :  { %v1169_v5 = vpop.f32.mrf.mxu1 }
 0x39c   :  { %v694_v6 = vmax.f32 %v691_v4, 0.0 }
 0x39e   :  { %1203 = vmatmul.mubr.f32.vlgmr.msra.gmra.mxu0 %v694_v6 }
 0x3b9   :  { %v863_v7 = vpop.f32.mrf.mxu1 }
 0x3bb   :  { %v1239_v8 = vpop.f32.mrf.mxu1 }
 0x45e   :  { %v793_v9 = vpop.f32.mrf.mxu0 }
 0x45f   :  { %v864_v11 = vadd.f32 %v863_v7, %v793_v9 }
 0x460   :  { %v1204_v12 = vpop.f32.mrf.mxu0 }
 0x461   :  { %v874_v0 = vadd.f32 %v906_v10, %v864_v11 }
 0x463   :  { %v907_v13 = vclamps-f32 %v874_v0, 5.0 }
 0x465   :  { %v879_v14 = vsub.f32 0.0, %v907_v13 }
 0x467   :  { %v880_v15 = vmul.f32 1.442695, %v879_v14 }
 0x469   :  { %1252 = vpow2.f32 %v880_v15 }
 0x476   :  { %v1253_v16 = vpop.eup %1252 }
 0x477   :  { %v882_v17 = vadd.f32 1.0, %v1253_v16 }
 0x479   :  { %1254 = vrcp.f32 %v882_v17 }
 0x486   :  { %v1255_v20 = vpop.eup %1254 }
 0x487   :  { %v885_v21 = vsel %vm884_vm2, %v1255_v20, %v874_v0 }
 0x488   :  { %887 = vst.msk [vmem:[%s1898_s16] sm:$0xff] %vm886_vm3, %v885_v21 }
 0x489   :  { %892 = vsyncpa [#allocation3], 1 }
 0x48a   :  { %893 = vsyncpa [#allocation5], 1 }
 0x48b   :  { %894 = vsyncpa [#allocation8], 1 }
 0x48c   :  { %895 = vsyncpa [#allocation11], 1 }
 0x48d   :  { %896 = vsyncpa [#allocation14], 1 }

</bundles_post_ra>
